<compile_context>
chip_gen: v5e
topology: v5e:2x2
jax: 0.10.0
libtpu: 0.0.40
codegen_flags: <defaults>
</compile_context>

<pallas_src>
import math

import jax
import jax.numpy as jnp
from jax import lax
from jax.experimental import pallas as pl
from jax.experimental.pallas import tpu as pltpu

# Standard (M,K)x(K,N) contraction: lhs last dim with rhs first dim.
_STD = (((1,), (0,)), ((), ()))
# Contract last dims of both operands (v1 @ v2^T without materializing v2^T).
_CONTRACT_LAST = (((1,), (1,)), ((), ()))


def _model_kernel(x1_ref, x2_ref, wt_ref, b_ref, o_ref):
    wt = wt_ref[...]                # (128, 64) — already transposed in wrapper
    b = b_ref[...]                  # (1, 64)

    # Shared Linear on each input; both are MXU-native (no transposed weight).
    v1 = lax.dot_general(x1_ref[...], wt, _STD,
                         preferred_element_type=jnp.float32) + b   # (B, 64)
    v2 = lax.dot_general(x2_ref[...], wt, _STD,
                         preferred_element_type=jnp.float32) + b   # (B, 64)

    # v3 = v1 @ v2^T via contracting-dim selection on the tiny VMEM-resident
    # v2 tile (single-vreg scale at B=2; no materialized transpose).
    v3 = lax.dot_general(v1, v2, _CONTRACT_LAST,
                         preferred_element_type=jnp.float32)        # (B, B)

    # Matches torch: v3 / sqrt(v3.size(-1)), i.e. sqrt(B).
    scale = 1.0 / math.sqrt(o_ref.shape[-1])
    o_ref[...] = (v3 * scale).astype(o_ref.dtype)


@jax.jit
def model_forward(x1, x2, weight, bias):
    B = x1.shape[0]
    # One-time param prep (amortized / constant-folded under jit): transpose
    # the 32 KB weight so both Linears run as standard matmuls; keep bias 2D.
    wt = weight.T                                   # (128, 64)
    bias2d = bias.reshape(1, -1)                    # (1, 64)

    return pl.pallas_call(
        _model_kernel,
        out_shape=jax.ShapeDtypeStruct((B, B), jnp.float32),
        in_specs=[
            pl.BlockSpec(memory_space=pltpu.MemorySpace.VMEM),  # x1  (B, 128)
            pl.BlockSpec(memory_space=pltpu.MemorySpace.VMEM),  # x2  (B, 128)
            pl.BlockSpec(memory_space=pltpu.MemorySpace.VMEM),  # Wt  (128, 64)
            pl.BlockSpec(memory_space=pltpu.MemorySpace.VMEM),  # b   (1, 64)
        ],
        out_specs=pl.BlockSpec(memory_space=pltpu.MemorySpace.VMEM),
    )(x1, x2, wt, bias2d)


if __name__ == "__main__":
    key = jax.random.PRNGKey(0)
    k_x1, k_x2, k_w, k_b = jax.random.split(key, 4)

    B, IN, OUT = 2, 128, 64
    x1 = jax.random.normal(k_x1, (B, IN), dtype=jnp.float32)
    x2 = jax.random.normal(k_x2, (B, IN), dtype=jnp.float32)
    # Deterministic Linear(128, 64) params (PyTorch-style uniform init range).
    bound = 1.0 / math.sqrt(IN)
    weight = jax.random.uniform(k_w, (OUT, IN), minval=-bound, maxval=bound,
                                dtype=jnp.float32)
    bias = jax.random.uniform(k_b, (OUT,), minval=-bound, maxval=bound,
                              dtype=jnp.float32)

    out = model_forward(x1, x2, weight, bias)
    out = jax.block_until_ready(out)

    # Plain-JAX reference mirroring the PyTorch forward.
    v1 = x1 @ weight.T + bias
    v2 = x2 @ weight.T + bias
    v3 = v1 @ v2.T
    ref = v3 / math.sqrt(v3.shape[-1])
    assert out.shape == (B, B)
    assert jnp.allclose(out, ref, atol=1e-5, rtol=1e-5)

    print("KERNEL_OK")
</pallas_src>

<mosaic_0001>
module attributes {stable_mosaic.version = 11 : i64} {
  func.func @_model_kernel(%arg0: memref<2x128xf32, #tpu.memory_space<vmem>>, %arg1: memref<2x128xf32, #tpu.memory_space<vmem>>, %arg2: memref<128x64xf32, #tpu.memory_space<vmem>>, %arg3: memref<1x64xf32, #tpu.memory_space<vmem>>, %arg4: memref<2x2xf32, #tpu.memory_space<vmem>>) attributes {dimension_semantics = [], scalar_prefetch = 0 : i64, scratch_operands = 0 : i64, tpu.core_type = #tpu.core_type<tc>} {
    %c0 = arith.constant 0 : index
    %c0_0 = arith.constant 0 : index
    %0 = vector.load %arg2[%c0, %c0_0] : memref<128x64xf32, #tpu.memory_space<vmem>>, vector<128x64xf32>
    %c0_1 = arith.constant 0 : index
    %c0_2 = arith.constant 0 : index
    %1 = vector.load %arg3[%c0_1, %c0_2] : memref<1x64xf32, #tpu.memory_space<vmem>>, vector<1x64xf32>
    %c0_3 = arith.constant 0 : index
    %c0_4 = arith.constant 0 : index
    %2 = vector.load %arg0[%c0_3, %c0_4] : memref<2x128xf32, #tpu.memory_space<vmem>>, vector<2x128xf32>
    %cst = arith.constant dense<0.000000e+00> : vector<2x64xf32>
    %3 = tpu.matmul %2, %0, %cst {dimension_numbers = #tpu.dot_dimension_numbers<[1], [0], [0], [1], [0, 0, 1, 1], [], []>} : vector<2x128xf32>, vector<128x64xf32>, vector<2x64xf32> -> vector<2x64xf32>
    %4 = vector.broadcast %1 : vector<1x64xf32> to vector<2x64xf32>
    %5 = arith.addf %3, %4 : vector<2x64xf32>
    %c0_5 = arith.constant 0 : index
    %c0_6 = arith.constant 0 : index
    %6 = vector.load %arg1[%c0_5, %c0_6] : memref<2x128xf32, #tpu.memory_space<vmem>>, vector<2x128xf32>
    %cst_7 = arith.constant dense<0.000000e+00> : vector<2x64xf32>
    %7 = tpu.matmul %6, %0, %cst_7 {dimension_numbers = #tpu.dot_dimension_numbers<[1], [0], [0], [1], [0, 0, 1, 1], [], []>} : vector<2x128xf32>, vector<128x64xf32>, vector<2x64xf32> -> vector<2x64xf32>
    %8 = vector.broadcast %1 : vector<1x64xf32> to vector<2x64xf32>
    %9 = arith.addf %7, %8 : vector<2x64xf32>
    %cst_8 = arith.constant dense<0.000000e+00> : vector<2x2xf32>
    %10 = tpu.matmul %5, %9, %cst_8 {dimension_numbers = #tpu.dot_dimension_numbers<[1], [1], [0], [0], [0, 0, 1, 0], [], []>} : vector<2x64xf32>, vector<2x64xf32>, vector<2x2xf32> -> vector<2x2xf32>
    %cst_9 = arith.constant 0.707106769 : f32
    %11 = vector.broadcast %cst_9 : f32 to vector<2x2xf32>
    %12 = arith.mulf %10, %11 : vector<2x2xf32>
    %c0_10 = arith.constant 0 : index
    %c0_11 = arith.constant 0 : index
    %13 = vector.load %arg4[%c0_10, %c0_11] : memref<2x2xf32, #tpu.memory_space<vmem>>, vector<2x2xf32>
    tpu.vector_store %arg4[%c0_10, %c0_11], %12 {strides = array<i32>} : memref<2x2xf32, #tpu.memory_space<vmem>>, vector<2x2xf32>,
    return
  }
}

</mosaic_0001>

<bundles_post_ra>
// kernel: model_forward.1
= control target key start
LH: loop header
LB: loop body
LE: loop exit
PB: predicated region body
PF: predicated region fallthrough
CT: control target
= control target key end

     0   :  { %s242_s0 = inlined_call_operand.vmem [shape: f32[2,128], index: 0, kind: input, shape index: {}]   ;;  %s243_s1 = inlined_call_operand.vmem [shape: f32[2,128], index: 1, kind: input, shape index: {}]   ;;  %s244_s2 = inlined_call_operand.vmem [shape: f32[128,64], index: 2, kind: input, shape index: {}]   ;;  %s245_s3 = inlined_call_operand.vmem [shape: f32[1,64], index: 3, kind: input, shape index: {}]   ;;  %s246_s4 = inlined_call_operand.hbm [shape: f32[2,2], index: 4, kind: output, shape index: {}]  }
   0x1   :  { %v33_v0 = vld [vmem:[%s244_s2 + $0x78] sm:$0xff]  ;;  %v32_v1 = vld [vmem:[%s244_s2 + $0x70] sm:$0xff]  ;;  %v31_v2 = vld [vmem:[%s244_s2 + $0x68] sm:$0xff] }
   0x2   :  { %60 = vmatpush.msra.mxu1 %v33_v0  ;;  %39 = vmatpush.msra.mxu0 %v33_v0  ;;  %v30_v3 = vld [vmem:[%s244_s2 + $0x60] sm:$0xff]  ;;  %v29_v4 = vld [vmem:[%s244_s2 + $0x58] sm:$0xff] }
   0x4   :  { %61 = vmatpush.msra.mxu1 %v32_v1  ;;  %40 = vmatpush.msra.mxu0 %v32_v1 }
   0x6   :  { %62 = vmatpush.msra.mxu1 %v31_v2  ;;  %41 = vmatpush.msra.mxu0 %v31_v2 }
   0x7   :  { %9 = vsyncpa [#allocation3], 0  ;;  %v28_v5 = vld [vmem:[%s244_s2 + $0x50] sm:$0xff]  ;;  %v27_v6 = vld [vmem:[%s244_s2 + $0x48] sm:$0xff]  ;;  %vm80_vm0 = vcmask 523264   ;;  %vm108_vm1 = vcmask 9216  }
   0x8   :  { %63 = vmatpush.msra.mxu1 %v30_v3  ;;  %42 = vmatpush.msra.mxu0 %v30_v3  ;;  %v26_v7 = vld [vmem:[%s244_s2 + $0x40] sm:$0xff]  ;;  %v25_v8 = vld [vmem:[%s244_s2 + $0x38] sm:$0xff]  ;;  %v24_v9 = vld [vmem:[%s244_s2 + $0x30] sm:$0xff] }
   0x9   :  { %v23_v10 = vld [vmem:[%s244_s2 + $0x28] sm:$0xff]  ;;  %v22_v11 = vld [vmem:[%s244_s2 + $0x20] sm:$0xff]  ;;  %v21_v12 = vld [vmem:[%s244_s2 + $0x18] sm:$0xff] }
   0xa   :  { %64 = vmatpush.msra.mxu1 %v29_v4  ;;  %43 = vmatpush.msra.mxu0 %v29_v4  ;;  %v20_v13 = vld [vmem:[%s244_s2 + $0x10] sm:$0xff]  ;;  %v19_v14 = vld [vmem:[%s244_s2 + $0x8] sm:$0xff]  ;;  %v18_v15 = vld [vmem:[%s244_s2] sm:$0xff] }
   0xb   :  { %v59_v16 = vld [vmem:[%s243_s1] sm:$0x3]  ;;  %s156_s1 = smov [#allocation2]  }
   0xc   :  { %65 = vmatpush.msra.mxu1 %v28_v5  ;;  %44 = vmatpush.msra.mxu0 %v28_v5  ;;  %v35_v17 = vld [vmem:[%s242_s0] sm:$0x3]  ;;  %s115_s2 = sshll.u32 %s156_s1, 4  ;;  %s117_s0 = sshll.u32 %s246_s4, 4  ;;  %s116_s2 = int_to_ptr.vmem [resolvable:$true] %s115_s2  ;;  %s118_s0 = int_to_ptr.hbm [resolvable:$true] %s117_s0 }
   0xd   :  { %v129_v18 = vld [vmem:[%s245_s3] ss:$0 sm:$0xff] }
   0xe   :  { %66 = vmatpush.msra.mxu1 %v27_v6  ;;  %45 = vmatpush.msra.mxu0 %v27_v6 }
  0x10   :  { %67 = vmatpush.msra.mxu1 %v26_v7  ;;  %46 = vmatpush.msra.mxu0 %v26_v7 }
  0x12   :  { %68 = vmatpush.msra.mxu1 %v25_v8  ;;  %47 = vmatpush.msra.mxu0 %v25_v8 }
  0x14   :  { %69 = vmatpush.msra.mxu1 %v24_v9  ;;  %48 = vmatpush.msra.mxu0 %v24_v9 }
  0x16   :  { %70 = vmatpush.msra.mxu1 %v23_v10  ;;  %49 = vmatpush.msra.mxu0 %v23_v10 }
  0x18   :  { %71 = vmatpush.msra.mxu1 %v22_v11  ;;  %50 = vmatpush.msra.mxu0 %v22_v11 }
  0x1a   :  { %72 = vmatpush.msra.mxu1 %v21_v12  ;;  %51 = vmatpush.msra.mxu0 %v21_v12 }
  0x1c   :  { %73 = vmatpush.msra.mxu1 %v20_v13  ;;  %52 = vmatpush.msra.mxu0 %v20_v13 }
  0x1e   :  { %74 = vmatpush.msra.mxu1 %v19_v14  ;;  %53 = vmatpush.msra.mxu0 %v19_v14 }
  0x20   :  { %75 = vmatpush.msra.mxu1 %v18_v15  ;;  %54 = vmatpush.msra.mxu0 %v18_v15 }
  0x21   :  { %76 = vmatmul.f32.vlgmr.msra.gmra.mxu1 %v59_v16  ;;  %55 = vmatmul.f32.vlgmr.msra.gmra.mxu0 %v35_v17 }
  0x9e   :  { %v77_v19 = vpop.f32.mrf.mxu1  ;;  %v56_v20 = vpop.f32.mrf.mxu0 }
  0x9f   :  { %v78_v21 = vadd.f32 %v129_v18, %v77_v19  ;;  %v57_v22 = vadd.f32 %v129_v18, %v56_v20 }
  0xa1   :  { %126 = vmatpush.xpose.msk.msra.mxu2 %vm80_vm0, %v78_v21 }
  0xa4   :  { %127 = vmatmul.msk.f32.vlgmr.msra.gmra.mxu2 %vm80_vm0, %v57_v22 }
 0x127   :  { %v104_v23 = vpop.f32.mrf.mxu2 }
 0x128   :  { %v107_v24 = vmul.f32 0.70710677, %v104_v23 }
 0x12a   :  { %109 = vst.msk [vmem:[#allocation2] sm:$0x3] %vm108_vm1, %v107_v24 }
 0x12b   :  { %120 = dma.vmem_to_hbm [thread:$0]  %s116_s2, 32, %s118_s0, [#allocation3]  }
 0x12c   :  { %154 = dma.done.wait [#allocation3], 32  }
 0x12d   :  { %155 = vsyncadd [#allocation3], 4294967264 }
 0x12e   :  { %125 = vsyncpa [#allocation3], 1 }

</bundles_post_ra>
